<compile_context>
chip_gen: v7x
topology: tpu7x:2x2x1
jax: 0.10.0
libtpu: 0.0.40
codegen_flags: <defaults>
</compile_context>

<pallas_src>
import functools

import jax
import jax.numpy as jnp
import numpy as np
from jax import lax
from jax.experimental import pallas as pl
from jax.experimental.pallas import tpu as pltpu

_LANE = 128
_NEG_PAD = -1e30  # bias for padded class columns -> exp() underflows to exactly 0


def _round_up(x, m):
    return ((x + m - 1) // m) * m


# ----------------------------------------------------------------------------
# Fused forward kernel (single invocation, everything VMEM-resident)
# ----------------------------------------------------------------------------
def _sage_forward_kernel(x_ref, a_ref, dinv_ref, w1T_ref, b1_ref, wlT_ref,
                         bl_ref, wrT_ref, w2T_ref, b2_ref, o_ref, *,
                         num_layers):
    f32 = jnp.float32

    # first_lin + ReLU (contraction dim pre-padded to 128 -> aligned MXU passes)
    h = jnp.maximum(
        jnp.dot(x_ref[...], w1T_ref[...], preferred_element_type=f32)
        + b1_ref[...],
        0.0,
    )
    # TODO(synk): F.dropout is identity in eval mode (training=False); the
    # training-mode RNG mask is intentionally not implemented here.

    # Unnormalized edge-count adjacency arrives as bf16 (small integer counts
    # are exactly representable -> lossless); promote once and apply the
    # 1/in-degree mean scale as a post-multiply (hidden under the matmul).
    a = a_ref[...].astype(f32)      # (N, N)
    dinv = dinv_ref[...]            # (N, 1)

    for l in range(num_layers):     # tiny static trip count -> unrolled
        # mean neighborhood aggregation: aggr[i] = (1/deg_i) * sum_{j -> i} h[j]
        aggr = dinv * jnp.dot(a, h, preferred_element_type=f32)
        # SAGEConv: lin_l(aggr) (+bias) + lin_r(h) (no bias)
        out = (jnp.dot(aggr, wlT_ref[l], preferred_element_type=f32)
               + bl_ref[l]
               + jnp.dot(h, wrT_ref[l], preferred_element_type=f32))
        # normalize=True -> F.normalize(out, p=2, dim=-1, eps=1e-12)
        # (rsqrt with the eps clamp moved to sumsq at eps^2)
        sumsq = jnp.sum(out * out, axis=-1, keepdims=True)
        out = out * lax.rsqrt(jnp.maximum(sumsq, 1e-24))
        # ReLU (from SAGE.forward); dropout elided (eval mode)
        h = jnp.maximum(out, 0.0)

    # lin2 + log_softmax(dim=-1).  Class dim is padded to 128 lanes; padded
    # columns carry a -1e30 bias so they contribute exactly 0 to the softmax.
    logits = (jnp.dot(h, w2T_ref[...], preferred_element_type=f32)
              + b2_ref[...])
    m = jnp.max(logits, axis=-1, keepdims=True)
    shifted = logits - m
    lse = jnp.log(jnp.sum(jnp.exp(shifted), axis=-1, keepdims=True))
    # single lane-dense (N, 128) store
    o_ref[...] = (shifted - lse).astype(o_ref.dtype)


# ----------------------------------------------------------------------------
# Host-side glue
# ----------------------------------------------------------------------------
def build_adjacency(edge_index, num_nodes):
    """Unnormalized edge-count adjacency + inverse in-degree (no XLA scatter).

    counts[i, j] = number of edges j -> i  (messages flow src -> dst).
    """
    src, dst = edge_index[0], edge_index[1]
    ids = jnp.arange(num_nodes, dtype=edge_index.dtype)
    src_oh = (src[:, None] == ids[None, :]).astype(jnp.float32)   # (E, N)
    dst_oh = (dst[:, None] == ids[None, :]).astype(jnp.float32)   # (E, N)
    counts = jnp.dot(dst_oh.T, src_oh)                            # (N, N)
    deg = jnp.sum(counts, axis=1, keepdims=True)
    deg_inv = 1.0 / jnp.maximum(deg, 1.0)                         # isolated -> 0 row
    return counts, deg_inv


@functools.partial(jax.jit, static_argnames=("num_layers",))
def sage_forward(params, x, edge_index, *, num_layers):
    N, F_in = x.shape
    H = params["w1"].shape[0]
    C = params["w2"].shape[0]
    F_pad = _round_up(F_in, _LANE)
    C_pad = _round_up(C, _LANE)

    counts, deg_inv = build_adjacency(edge_index, N)
    a_bf16 = counts.astype(jnp.bfloat16)   # 0/1/2... counts: exact in bf16

    # Pre-transpose / pad weights so every in-kernel matmul is a row-major dot
    # with lane-aligned contraction (100 -> 128) and output (18 -> 128) dims.
    x_pad = jnp.pad(x, ((0, 0), (0, F_pad - F_in)))
    w1T = jnp.pad(params["w1"].T, ((0, F_pad - F_in), (0, 0)))    # (F_pad, H)
    b1 = params["b1"].reshape(1, H)
    wlT = jnp.transpose(params["wl"], (0, 2, 1))                  # (L, H, H)
    bl = params["bl"].reshape(num_layers, 1, H)
    wrT = jnp.transpose(params["wr"], (0, 2, 1))                  # (L, H, H)
    w2T = jnp.pad(params["w2"].T, ((0, 0), (0, C_pad - C)))       # (H, C_pad)
    b2 = jnp.pad(params["b2"].reshape(1, C), ((0, 0), (0, C_pad - C)),
                 constant_values=_NEG_PAD)                        # (1, C_pad)

    def nb(shape, dtype):
        return int(np.prod(shape)) * jnp.dtype(dtype).itemsize

    bytes_accessed = (
        nb((N, F_pad), jnp.float32) + nb((N, N), jnp.bfloat16)
        + nb((N, 1), jnp.float32) + nb((F_pad, H), jnp.float32)
        + nb((1, H), jnp.float32) + 2 * nb((num_layers, H, H), jnp.float32)
        + nb((num_layers, 1, H), jnp.float32) + nb((H, C_pad), jnp.float32)
        + nb((1, C_pad), jnp.float32) + nb((N, C_pad), jnp.float32))
    flops = (2 * N * F_pad * H
             + num_layers * (2 * N * N * H + 4 * N * H * H)
             + 2 * N * H * C_pad)
    transcendentals = N * C_pad + num_layers * N + N
    cost = pl.CostEstimate(flops=flops, transcendentals=transcendentals,
                           bytes_accessed=bytes_accessed)

    # No grid -> one invocation; each operand lives in VMEM exactly once
    # (no wasted double buffer). Total footprint is a few tens of KiB.
    vmem = pl.BlockSpec(memory_space=pltpu.MemorySpace.VMEM)
    kernel = functools.partial(_sage_forward_kernel, num_layers=num_layers)
    out_pad = pl.pallas_call(
        kernel,
        out_shape=jax.ShapeDtypeStruct((N, C_pad), x.dtype),
        in_specs=[vmem] * 10,
        out_specs=vmem,
        cost_estimate=cost,
    )(x_pad, a_bf16, deg_inv, w1T, b1, wlT, bl, wrT, w2T, b2)
    return out_pad[:, :C]


# ----------------------------------------------------------------------------
# Pure-JAX reference mirroring the PyTorch module (eval mode)
# ----------------------------------------------------------------------------
def sage_reference(params, x, edge_index, num_layers):
    hi = jax.lax.Precision.HIGHEST
    counts, deg_inv = build_adjacency(edge_index, x.shape[0])
    h = jax.nn.relu(jnp.dot(x, params["w1"].T, precision=hi) + params["b1"])
    for l in range(num_layers):
        aggr = deg_inv * jnp.dot(counts, h, precision=hi)
        out = (jnp.dot(aggr, params["wl"][l].T, precision=hi) + params["bl"][l]
               + jnp.dot(h, params["wr"][l].T, precision=hi))
        norm = jnp.sqrt(jnp.sum(out * out, axis=-1, keepdims=True))
        out = out / jnp.maximum(norm, 1e-12)
        h = jax.nn.relu(out)
    logits = jnp.dot(h, params["w2"].T, precision=hi) + params["b2"]
    return jax.nn.log_softmax(logits, axis=-1)


# ----------------------------------------------------------------------------
# Parameter init (PyTorch Linear-style uniform bounds; exact init irrelevant)
# ----------------------------------------------------------------------------
def init_params(key, num_node_features, hidden, num_class, num_layers):
    keys = jax.random.split(key, 2 + 2 * num_layers)

    def linear(k, fan_out, fan_in):
        bound = 1.0 / np.sqrt(fan_in)
        kw, kb = jax.random.split(k)
        w = jax.random.uniform(kw, (fan_out, fan_in), jnp.float32, -bound, bound)
        b = jax.random.uniform(kb, (fan_out,), jnp.float32, -bound, bound)
        return w, b

    w1, b1 = linear(keys[0], hidden, num_node_features)
    wl, bl, wr = [], [], []
    for i in range(num_layers):
        wl_i, bl_i = linear(keys[1 + i], hidden, hidden)
        wr_i, _ = linear(keys[1 + num_layers + i], hidden, hidden)
        wl.append(wl_i)
        bl.append(bl_i)
        wr.append(wr_i)
    w2, b2 = linear(keys[-1], num_class, hidden)
    return {
        "w1": w1, "b1": b1,
        "wl": jnp.stack(wl), "bl": jnp.stack(bl), "wr": jnp.stack(wr),
        "w2": w2, "b2": b2,
    }


if __name__ == "__main__":
    num_nodes = 16
    num_node_features = 100
    hidden = 16
    num_class = 18
    num_layers = 2

    key = jax.random.PRNGKey(0)
    k_x, k_e, k_p = jax.random.split(key, 3)

    # Node features (data.x)
    x = jax.random.normal(k_x, (num_nodes, num_node_features), jnp.float32)

    # Deterministic small graph: bidirectional ring + 8 random extra edges.
    ring = jnp.arange(num_nodes, dtype=jnp.int32)
    rnd_src = jax.random.randint(k_e, (8,), 0, num_nodes, jnp.int32)
    rnd_dst = jax.random.randint(jax.random.fold_in(k_e, 1), (8,), 0, num_nodes,
                                 jnp.int32)
    src = jnp.concatenate([ring, (ring + 1) % num_nodes, rnd_src])
    dst = jnp.concatenate([(ring + 1) % num_nodes, ring, rnd_dst])
    edge_index = jnp.stack([src, dst])  # (2, 40); messages flow src -> dst

    params = init_params(k_p, num_node_features, hidden, num_class, num_layers)

    out = sage_forward(params, x, edge_index, num_layers=num_layers)
    out = jax.block_until_ready(out)

    ref = jax.block_until_ready(sage_reference(params, x, edge_index, num_layers))
    np.testing.assert_allclose(np.asarray(out), np.asarray(ref),
                               rtol=1e-3, atol=1e-3)

    print("KERNEL_OK")
</pallas_src>

<mosaic_0001>
module attributes {stable_mosaic.version = 11 : i64} {
  func.func @_sage_forward_kernel(%arg0: memref<16x128xf32, #tpu.memory_space<vmem>>, %arg1: memref<16x16xbf16, #tpu.memory_space<vmem>>, %arg2: memref<16x1xf32, #tpu.memory_space<vmem>>, %arg3: memref<128x16xf32, #tpu.memory_space<vmem>>, %arg4: memref<1x16xf32, #tpu.memory_space<vmem>>, %arg5: memref<2x16x16xf32, #tpu.memory_space<vmem>>, %arg6: memref<2x1x16xf32, #tpu.memory_space<vmem>>, %arg7: memref<2x16x16xf32, #tpu.memory_space<vmem>>, %arg8: memref<16x128xf32, #tpu.memory_space<vmem>>, %arg9: memref<1x128xf32, #tpu.memory_space<vmem>>, %arg10: memref<16x128xf32, #tpu.memory_space<vmem>>) attributes {dimension_semantics = [], scalar_prefetch = 0 : i64, scratch_operands = 0 : i64, tpu.core_type = #tpu.core_type<tc>} {
    %c0 = arith.constant 0 : index
    %c0_0 = arith.constant 0 : index
    %0 = vector.load %arg0[%c0, %c0_0] : memref<16x128xf32, #tpu.memory_space<vmem>>, vector<16x128xf32>
    %c0_1 = arith.constant 0 : index
    %c0_2 = arith.constant 0 : index
    %1 = vector.load %arg3[%c0_1, %c0_2] : memref<128x16xf32, #tpu.memory_space<vmem>>, vector<128x16xf32>
    %cst = arith.constant dense<0.000000e+00> : vector<16x16xf32>
    %2 = tpu.matmul %0, %1, %cst {dimension_numbers = #tpu.dot_dimension_numbers<[1], [0], [0], [1], [0, 0, 1, 1], [], []>} : vector<16x128xf32>, vector<128x16xf32>, vector<16x16xf32> -> vector<16x16xf32>
    %c0_3 = arith.constant 0 : index
    %c0_4 = arith.constant 0 : index
    %3 = vector.load %arg4[%c0_3, %c0_4] : memref<1x16xf32, #tpu.memory_space<vmem>>, vector<1x16xf32>
    %4 = vector.broadcast %3 : vector<1x16xf32> to vector<16x16xf32>
    %5 = arith.addf %2, %4 : vector<16x16xf32>
    %cst_5 = arith.constant 0.000000e+00 : f32
    %6 = vector.broadcast %cst_5 : f32 to vector<16x16xf32>
    %7 = arith.maximumf %5, %6 : vector<16x16xf32>
    %c0_6 = arith.constant 0 : index
    %c0_7 = arith.constant 0 : index
    %8 = vector.load %arg1[%c0_6, %c0_7] : memref<16x16xbf16, #tpu.memory_space<vmem>>, vector<16x16xbf16>
    %9 = arith.extf %8 : vector<16x16xbf16> to vector<16x16xf32>
    %c0_8 = arith.constant 0 : index
    %c0_9 = arith.constant 0 : index
    %10 = vector.load %arg2[%c0_8, %c0_9] : memref<16x1xf32, #tpu.memory_space<vmem>>, vector<16x1xf32>
    %cst_10 = arith.constant dense<0.000000e+00> : vector<16x16xf32>
    %11 = tpu.matmul %9, %7, %cst_10 {dimension_numbers = #tpu.dot_dimension_numbers<[1], [0], [0], [1], [0, 0, 1, 1], [], []>} : vector<16x16xf32>, vector<16x16xf32>, vector<16x16xf32> -> vector<16x16xf32>
    %12 = vector.broadcast %10 : vector<16x1xf32> to vector<16x16xf32>
    %13 = arith.mulf %12, %11 : vector<16x16xf32>
    %c0_11 = arith.constant 0 : index
    %c0_12 = arith.constant 0 : index
    %c0_13 = arith.constant 0 : index
    %14 = vector.load %arg5[%c0_11, %c0_12, %c0_13] : memref<2x16x16xf32, #tpu.memory_space<vmem>>, vector<1x16x16xf32>
    %15 = vector.shape_cast %14 : vector<1x16x16xf32> to vector<16x16xf32>
    %cst_14 = arith.constant dense<0.000000e+00> : vector<16x16xf32>
    %16 = tpu.matmul %13, %15, %cst_14 {dimension_numbers = #tpu.dot_dimension_numbers<[1], [0], [0], [1], [0, 0, 1, 1], [], []>} : vector<16x16xf32>, vector<16x16xf32>, vector<16x16xf32> -> vector<16x16xf32>
    %c0_15 = arith.constant 0 : index
    %c0_16 = arith.constant 0 : index
    %c0_17 = arith.constant 0 : index
    %17 = vector.load %arg6[%c0_15, %c0_16, %c0_17] : memref<2x1x16xf32, #tpu.memory_space<vmem>>, vector<1x1x16xf32>
    %18 = vector.shape_cast %17 : vector<1x1x16xf32> to vector<1x16xf32>
    %19 = vector.broadcast %18 : vector<1x16xf32> to vector<16x16xf32>
    %20 = arith.addf %16, %19 : vector<16x16xf32>
    %c0_18 = arith.constant 0 : index
    %c0_19 = arith.constant 0 : index
    %c0_20 = arith.constant 0 : index
    %21 = vector.load %arg7[%c0_18, %c0_19, %c0_20] : memref<2x16x16xf32, #tpu.memory_space<vmem>>, vector<1x16x16xf32>
    %22 = vector.shape_cast %21 : vector<1x16x16xf32> to vector<16x16xf32>
    %cst_21 = arith.constant dense<0.000000e+00> : vector<16x16xf32>
    %23 = tpu.matmul %7, %22, %cst_21 {dimension_numbers = #tpu.dot_dimension_numbers<[1], [0], [0], [1], [0, 0, 1, 1], [], []>} : vector<16x16xf32>, vector<16x16xf32>, vector<16x16xf32> -> vector<16x16xf32>
    %24 = arith.addf %20, %23 : vector<16x16xf32>
    %25 = arith.mulf %24, %24 : vector<16x16xf32>
    %cst_22 = arith.constant dense<0.000000e+00> : vector<16xf32>
    %26 = vector.multi_reduction <add>, %25, %cst_22 [1] : vector<16x16xf32> to vector<16xf32>
    %27 = vector.shape_cast %26 : vector<16xf32> to vector<16x1xf32>
    %cst_23 = arith.constant 1.000000e-24 : f32
    %28 = vector.broadcast %cst_23 : f32 to vector<16x1xf32>
    %29 = arith.maximumf %27, %28 : vector<16x1xf32>
    %30 = math.rsqrt %29 : vector<16x1xf32>
    %31 = vector.broadcast %30 : vector<16x1xf32> to vector<16x16xf32>
    %32 = arith.mulf %24, %31 : vector<16x16xf32>
    %cst_24 = arith.constant 0.000000e+00 : f32
    %33 = vector.broadcast %cst_24 : f32 to vector<16x16xf32>
    %34 = arith.maximumf %32, %33 : vector<16x16xf32>
    %cst_25 = arith.constant dense<0.000000e+00> : vector<16x16xf32>
    %35 = tpu.matmul %9, %34, %cst_25 {dimension_numbers = #tpu.dot_dimension_numbers<[1], [0], [0], [1], [0, 0, 1, 1], [], []>} : vector<16x16xf32>, vector<16x16xf32>, vector<16x16xf32> -> vector<16x16xf32>
    %36 = vector.broadcast %10 : vector<16x1xf32> to vector<16x16xf32>
    %37 = arith.mulf %36, %35 : vector<16x16xf32>
    %c1 = arith.constant 1 : index
    %c0_26 = arith.constant 0 : index
    %c0_27 = arith.constant 0 : index
    %38 = vector.load %arg5[%c1, %c0_26, %c0_27] : memref<2x16x16xf32, #tpu.memory_space<vmem>>, vector<1x16x16xf32>
    %39 = vector.shape_cast %38 : vector<1x16x16xf32> to vector<16x16xf32>
    %cst_28 = arith.constant dense<0.000000e+00> : vector<16x16xf32>
    %40 = tpu.matmul %37, %39, %cst_28 {dimension_numbers = #tpu.dot_dimension_numbers<[1], [0], [0], [1], [0, 0, 1, 1], [], []>} : vector<16x16xf32>, vector<16x16xf32>, vector<16x16xf32> -> vector<16x16xf32>
    %c1_29 = arith.constant 1 : index
    %c0_30 = arith.constant 0 : index
    %c0_31 = arith.constant 0 : index
    %41 = vector.load %arg6[%c1_29, %c0_30, %c0_31] : memref<2x1x16xf32, #tpu.memory_space<vmem>>, vector<1x1x16xf32>
    %42 = vector.shape_cast %41 : vector<1x1x16xf32> to vector<1x16xf32>
    %43 = vector.broadcast %42 : vector<1x16xf32> to vector<16x16xf32>
    %44 = arith.addf %40, %43 : vector<16x16xf32>
    %c1_32 = arith.constant 1 : index
    %c0_33 = arith.constant 0 : index
    %c0_34 = arith.constant 0 : index
    %45 = vector.load %arg7[%c1_32, %c0_33, %c0_34] : memref<2x16x16xf32, #tpu.memory_space<vmem>>, vector<1x16x16xf32>
    %46 = vector.shape_cast %45 : vector<1x16x16xf32> to vector<16x16xf32>
    %cst_35 = arith.constant dense<0.000000e+00> : vector<16x16xf32>
    %47 = tpu.matmul %34, %46, %cst_35 {dimension_numbers = #tpu.dot_dimension_numbers<[1], [0], [0], [1], [0, 0, 1, 1], [], []>} : vector<16x16xf32>, vector<16x16xf32>, vector<16x16xf32> -> vector<16x16xf32>
    %48 = arith.addf %44, %47 : vector<16x16xf32>
    %49 = arith.mulf %48, %48 : vector<16x16xf32>
    %cst_36 = arith.constant dense<0.000000e+00> : vector<16xf32>
    %50 = vector.multi_reduction <add>, %49, %cst_36 [1] : vector<16x16xf32> to vector<16xf32>
    %51 = vector.shape_cast %50 : vector<16xf32> to vector<16x1xf32>
    %cst_37 = arith.constant 1.000000e-24 : f32
    %52 = vector.broadcast %cst_37 : f32 to vector<16x1xf32>
    %53 = arith.maximumf %51, %52 : vector<16x1xf32>
    %54 = math.rsqrt %53 : vector<16x1xf32>
    %55 = vector.broadcast %54 : vector<16x1xf32> to vector<16x16xf32>
    %56 = arith.mulf %48, %55 : vector<16x16xf32>
    %cst_38 = arith.constant 0.000000e+00 : f32
    %57 = vector.broadcast %cst_38 : f32 to vector<16x16xf32>
    %58 = arith.maximumf %56, %57 : vector<16x16xf32>
    %c0_39 = arith.constant 0 : index
    %c0_40 = arith.constant 0 : index
    %59 = vector.load %arg8[%c0_39, %c0_40] : memref<16x128xf32, #tpu.memory_space<vmem>>, vector<16x128xf32>
    %cst_41 = arith.constant dense<0.000000e+00> : vector<16x128xf32>
    %60 = tpu.matmul %58, %59, %cst_41 {dimension_numbers = #tpu.dot_dimension_numbers<[1], [0], [0], [1], [0, 0, 1, 1], [], []>} : vector<16x16xf32>, vector<16x128xf32>, vector<16x128xf32> -> vector<16x128xf32>
    %c0_42 = arith.constant 0 : index
    %c0_43 = arith.constant 0 : index
    %61 = vector.load %arg9[%c0_42, %c0_43] : memref<1x128xf32, #tpu.memory_space<vmem>>, vector<1x128xf32>
    %62 = vector.broadcast %61 : vector<1x128xf32> to vector<16x128xf32>
    %63 = arith.addf %60, %62 : vector<16x128xf32>
    %cst_44 = arith.constant dense<0xFF800000> : vector<16xf32>
    %64 = vector.multi_reduction <maximumf>, %63, %cst_44 [1] : vector<16x128xf32> to vector<16xf32>
    %65 = vector.shape_cast %64 : vector<16xf32> to vector<16x1xf32>
    %66 = vector.broadcast %65 : vector<16x1xf32> to vector<16x128xf32>
    %67 = arith.subf %63, %66 : vector<16x128xf32>
    %68 = math.exp %67 : vector<16x128xf32>
    %cst_45 = arith.constant dense<0.000000e+00> : vector<16xf32>
    %69 = vector.multi_reduction <add>, %68, %cst_45 [1] : vector<16x128xf32> to vector<16xf32>
    %70 = vector.shape_cast %69 : vector<16xf32> to vector<16x1xf32>
    %71 = math.log %70 : vector<16x1xf32>
    %72 = vector.broadcast %71 : vector<16x1xf32> to vector<16x128xf32>
    %73 = arith.subf %67, %72 : vector<16x128xf32>
    %c0_46 = arith.constant 0 : index
    %c0_47 = arith.constant 0 : index
    %74 = vector.load %arg10[%c0_46, %c0_47] : memref<16x128xf32, #tpu.memory_space<vmem>>, vector<16x128xf32>
    tpu.vector_store %arg10[%c0_46, %c0_47], %73 {strides = array<i32>} : memref<16x128xf32, #tpu.memory_space<vmem>>, vector<16x128xf32>,
    return
  }
}

</mosaic_0001>

<bundles_post_ra>
// kernel: sage_forward.1
= control target key start
LH: loop header
LB: loop body
LE: loop exit
PB: predicated region body
PF: predicated region fallthrough
CT: control target
= control target key end

     0   :  { %s1296_s0 = inlined_call_operand.vmem [shape: f32[16,128], index: 0, kind: input, shape index: {}]   ;;  %s1297_s1 = inlined_call_operand.vmem [shape: bf16[16,16], index: 1, kind: input, shape index: {}]   ;;  %s1298_s2 = inlined_call_operand.vmem [shape: f32[16,1], index: 2, kind: input, shape index: {}]   ;;  %s1299_s3 = inlined_call_operand.vmem [shape: f32[128,16], index: 3, kind: input, shape index: {}]   ;;  %s1300_s4 = inlined_call_operand.vmem [shape: f32[1,16], index: 4, kind: input, shape index: {}]   ;;  %s1301_s5 = inlined_call_operand.vmem [shape: f32[2,16,16], index: 5, kind: input, shape index: {}]   ;;  %s1302_s6 = inlined_call_operand.vmem [shape: f32[2,1,16], index: 6, kind: input, shape index: {}]   ;;  %s1303_s7 = inlined_call_operand.vmem [shape: f32[2,16,16], index: 7, kind: input, shape index: {}]   ;;  %s1304_s8 = inlined_call_operand.vmem [shape: f32[16,128], index: 8, kind: input, shape index: {}]   ;;  %s1305_s9 = inlined_call_operand.vmem [shape: f32[1,128], index: 9, kind: input, shape index: {}]   ;;  %s1306_s10 = inlined_call_operand.hbm [shape: f32[16,128], index: 10, kind: output, shape index: {}]  }
   0x1   :  { %v38_v0 = vld [vmem:[%s1299_s3] sm:$0xff]  ;;  %v39_v1 = vld [vmem:[%s1299_s3 + $0x8] sm:$0xff]  ;;  %v40_v2 = vld [vmem:[%s1299_s3 + $0x10] sm:$0xff] }
   0x2   :  { %v985_v3 = vpack.c.bf16 %v39_v1, %v38_v0  ;;  %v41_v4 = vld [vmem:[%s1299_s3 + $0x18] sm:$0xff]  ;;  %v42_v6 = vld [vmem:[%s1299_s3 + $0x20] sm:$0xff]  ;;  %v43_v7 = vld [vmem:[%s1299_s3 + $0x28] sm:$0xff] }
   0x3   :  { %v989_v5 = vpack.c.bf16 %v41_v4, %v40_v2  ;;  %v993_v8 = vpack.c.bf16 %v43_v7, %v42_v6  ;;  %v36_v9 = vld [vmem:[%s1296_s0] sm:$0xff]  ;;  %v44_v10 = vld [vmem:[%s1299_s3 + $0x30] sm:$0xff]  ;;  %v45_v11 = vld [vmem:[%s1299_s3 + $0x38] sm:$0xff] }
   0x4   :  { %986 = vmatprep.subr.bf16.mxu0 %v985_v3  ;;  %933 = vmatprep.mubr.f32.mxu0 %v36_v9 }
   0x5   :  { %988 = vmatpush3.bf16.msra.mxu0 %v985_v3 }
   0x6   :  { %990 = vmatprep.subr.bf16.mxu0 %v989_v5 }
   0x7   :  { %15 = vsyncpa [#allocation3], 0  ;;  %v997_v12 = vpack.c.bf16 %v45_v11, %v44_v10  ;;  %v46_v13 = vld [vmem:[%s1299_s3 + $0x40] sm:$0xff]  ;;  %v47_v14 = vld [vmem:[%s1299_s3 + $0x48] sm:$0xff]  ;;  %vm144_vm0 = vcmask 130048   ;;  %v1098_v29 = vmov 0  }
   0x8   :  { %v1001_v15 = vpack.c.bf16 %v47_v14, %v46_v13  ;;  %v48_v16 = vld [vmem:[%s1299_s3 + $0x50] sm:$0xff]  ;;  %v49_v17 = vld [vmem:[%s1299_s3 + $0x58] sm:$0xff]  ;;  %v50_v19 = vld [vmem:[%s1299_s3 + $0x60] sm:$0xff]  ;;  %1057 = vset.pattern.permute.xlu0 %v1098_v29 }
   0x9   :  { %992 = vmatpush3.bf16.msra.mxu0 %v989_v5  ;;  %v1005_v18 = vpack.c.bf16 %v49_v17, %v48_v16  ;;  %v51_v20 = vld [vmem:[%s1299_s3 + $0x68] sm:$0xff]  ;;  %v52_v22 = vld [vmem:[%s1299_s3 + $0x70] sm:$0xff]  ;;  %v53_v23 = vld [vmem:[%s1299_s3 + $0x78] sm:$0xff] }
   0xa   :  { %994 = vmatprep.subr.bf16.mxu0 %v993_v8  ;;  %v1009_v21 = vpack.c.bf16 %v51_v20, %v50_v19  ;;  %v1013_v24 = vpack.c.bf16 %v53_v23, %v52_v22  ;;  %v37_v25 = vld [vmem:[%s1296_s0 + $0x8] sm:$0xff]  ;;  %v1214_v26 = vld [vmem:[%s1297_s1] sm:$0xff]   ;;  %v839_v9 = vld [vmem:[%s1301_s5 + $0x18] sm:$0xff] }
   0xb   :  { %v853_v27 = vunpack.c.l.bf16 %v1214_v26  ;;  %v142_v28 = vld [vmem:[%s1298_s2] sm:$0xff]  ;;  %v143_v30 = vld [vmem:[%s1298_s2 + $0x8] sm:$0xff]  ;;  %v854_v39 = vunpack.c.h.bf16 %v1214_v26  ;;  %v844_v11 = vld [vmem:[%s1303_s7 + $0x10] sm:$0xff] }
   0xc   :  { %228 = vperm.xlu0 %1057, %v142_v28   ;;  %v828_v31 = vld [vmem:[%s1300_s4] ss:$0 sm:$0xff]  ;;  %v239_v41 = vld [vmem:[%s1301_s5 + $0x8] sm:$0xff] }
   0xd   :  { %996 = vmatpush3.bf16.msra.mxu0 %v993_v8  ;;  %940 = vmatprep.mubr.msk.f32.mxu1 %vm144_vm0, %v853_v27  ;;  %v238_v40 = vld [vmem:[%s1301_s5] sm:$0xff]  ;;  %v329_v44 = vld [vmem:[%s1303_s7 + $0x8] sm:$0xff]  ;;  %v838_v8 = vld [vmem:[%s1301_s5 + $0x10] sm:$0xff] }
   0xe   :  { %998 = vmatprep.subr.bf16.mxu0 %v997_v12  ;;  %v1021_v42 = vpack.c.bf16 %v239_v41, %v238_v40  ;;  %v328_v43 = vld [vmem:[%s1303_s7] sm:$0xff]  ;;  %v1033_v10 = vpack.c.bf16 %v839_v9, %v838_v8  ;;  %v701_v28 = vld [vmem:[%s1304_s8 + $0x8] sm:$0xff] }
   0xf   :  { %v1025_v45 = vpack.c.bf16 %v329_v44, %v328_v43  ;;  %v831_v52 = vld [vmem:[%s1302_s6] ss:$0 sm:$0xff] }
  0x10   :  { %233 = vperm.xlu0 %1057, %v143_v30   ;;  %v848_v40 = vld [vmem:[%s1305_s9] ss:$0 sm:$0xff]  ;;  %s1099_s9 = smov [#allocation2]  }
  0x11   :  { %1000 = vmatpush3.bf16.msra.mxu0 %v997_v12  ;;  %v845_v12 = vld [vmem:[%s1303_s7 + $0x18] sm:$0xff]  ;;  %s817_s0 = sshll.u32 %s1099_s9, 4  ;;  %s818_s0 = int_to_ptr.vmem [resolvable:$true] %s817_s0 }
  0x12   :  { %1002 = vmatprep.subr.bf16.mxu0 %v1001_v15  ;;  %v1037_v13 = vpack.c.bf16 %v845_v12, %v844_v11  ;;  %s1074_s13 = scalar_lea.vmem %s818_s0, 256  ;;  %p1079_p1 = scmp.lt.s32.totalorder %s818_s0, %s818_s0 }
  0x13   :  { %p1075_p0 = scmp.ne.s32.totalorder %s818_s0, %s1074_s13  ;;  %p1080_p2 = scmp.lt.s32.totalorder %s1074_s13, %s1074_s13 }
  0x15   :  { %1004 = vmatpush3.bf16.msra.mxu0 %v1001_v15  ;;  %p1081_p3 = por %p1080_p2, %p1079_p1 }
  0x16   :  { %1006 = vmatprep.subr.bf16.mxu0 %v1005_v18 }
  0x17   :  { %p1082_p4 = pnand %p1081_p3, %p1075_p0 }
  0x19   :  { %1008 = vmatpush3.bf16.msra.mxu0 %v1005_v18  ;;  %v841_v18 = vld [vmem:[%s1302_s6 + $0x1] ss:$0 sm:$0xff] }
  0x1a   :  { %1010 = vmatprep.subr.bf16.mxu0 %v1009_v21 }
  0x1d   :  { %1012 = vmatpush3.bf16.msra.mxu0 %v1009_v21 }
  0x1e   :  { %1014 = vmatprep.subr.bf16.mxu0 %v1013_v24 }
  0x21   :  { %1016 = vmatpush3.bf16.msra.mxu0 %v1013_v24 }
  0x24   :  { %934 = vmatmul.mubr.f32.vlgmr.msra.gmra.mrb[0].mxu0 %v37_v25 }
  0x8b   :  { %v229_v46 = vpop.permute.xlu0 %228 }
  0x8f   :  { %v234_v49 = vpop.permute.xlu0 %233 }
  0xf7   :  { %v935_v32 = vpop.f32.mrb[0].mxu0 }
  0xf8   :  { %v133_v33 = vadd.f32 %v935_v32, %v828_v31  ;;  %v127_v34 = vpop.f32.mrb[1].mxu0 }
  0xf9   :  { %v128_v35 = vadd.f32 %v828_v31, %v127_v34 }
  0xfa   :  { %v137_v36 = vmax.f32 %v133_v33, 0.0 }
  0xfb   :  { %v136_v37 = vmax.f32 %v128_v35, 0.0 }
  0xfd   :  { %v1017_v38 = vpack.c.bf16 %v137_v36, %v136_v37 }
  0xff   :  { %1018 = vmatprep.subr.bf16.mxu1 %v1017_v38 }
 0x100   :  { %1020 = vmatpush3.bf16.msra.mxu1 %v1017_v38 }
 0x101   :  { %1022 = vmatprep.subr.bf16.mxu1 %v1021_v42 }
 0x103   :  { %941 = vmatmul.mubr.msk.f32.vlgmr.msra.gmra.mrb[0].mxu1 %vm144_vm0, %v854_v39 }
 0x104   :  { %1024 = vmatpush3.bf16.msra.mxu1 %v1021_v42 }
 0x105   :  { %1026 = vmatprep.subr.bf16.mxu1 %v1025_v45 }
 0x1d6   :  { %v942_v47 = vpop.f32.mrb[0].mxu1 }
 0x1d7   :  { %v217_v48 = vpop.f32.mrb[1].mxu1  ;;  %v237_v51 = vmul.f32 %v942_v47, %v234_v49 }
 0x1d8   :  { %v236_v50 = vmul.f32 %v229_v46, %v217_v48 }
 0x1da   :  { %947 = vmatprep.mubr.msk.f32.mxu1 %vm144_vm0, %v236_v50 }
 0x1db   :  { %948 = vmatmul.mubr.msk.f32.vlgmr.msra.gmra.mrb[2].mxu1 %vm144_vm0, %v237_v51 }
 0x1dc   :  { %1028 = vmatpush3.bf16.msra.mxu1 %v1025_v45  ;;  %954 = vmatprep.mubr.msk.f32.mxu1 %vm144_vm0, %v136_v37 }
 0x1e3   :  { %955 = vmatmul.mubr.msk.f32.vlgmr.msra.gmra.mrb[2].mxu1 %vm144_vm0, %v137_v36 }
 0x1e4   :  { %961 = vmatprep.mubr.msk.f32.mxu1 %vm144_vm0, %v853_v27  ;;  %v700_v27 = vld [vmem:[%s1304_s8] sm:$0xff] }
 0x1e5   :  { %v1041_v29 = vpack.c.bf16 %v701_v28, %v700_v27 }
 0x2b6   :  { %v956_v53 = vpop.f32.mrb[2].mxu1 }
 0x2b7   :  { %v402_v54 = vpop.f32.mrb[3].mxu1  ;;  %v1045_v55 = vadd.f32 %v956_v53, %v831_v52 }
 0x2b8   :  { %v1046_v56 = vadd.f32 %v831_v52, %v402_v54 }
 0x2b9   :  { %v414_v59 = vmul.f32 %v1045_v55, %v1045_v55 }
 0x2ba   :  { %v413_v57 = vmul.f32 %v1046_v56, %v1046_v56 }
 0x2bb   :  { %v418_v60 = vsel %vm144_vm0, %v414_v59, 0.0 }
 0x2bc   :  { %v415_v58 = vsel %vm144_vm0, %v413_v57, 0.0 }
 0x2bd   :  { %416 = vadd.xlane.f32.xlu1 %v415_v58 }
 0x2c1   :  { %419 = vadd.xlane.f32.xlu1 %v418_v60 }
 0x34a   :  { %v417_v61 = vpop.xlane.xlu1 %416 }
 0x34b   :  { %v421_v62 = vmax.f32 %v417_v61, 1e-24 }
 0x34d   :  { %1058 = vrsqrt.f32 %v421_v62 }
 0x34e   :  { %v420_v63 = vpop.xlane.xlu1 %419 }
 0x34f   :  { %v422_v0 = vmax.f32 %v420_v63, 1e-24 }
 0x351   :  { %1060 = vrsqrt.f32 %v422_v0 }
 0x357   :  { %v1059_v1 = vpop.eup %1058 }
 0x358   :  { %v425_v2 = vmul.f32 %v1059_v1, %v1046_v56 }
 0x35a   :  { %v427_v5 = vmax.f32 %v425_v2, 0.0 }
 0x35b   :  { %v1061_v3 = vpop.eup %1060 }
 0x35c   :  { %v426_v4 = vmul.f32 %v1061_v3, %v1045_v55 }
 0x35e   :  { %v428_v6 = vmax.f32 %v426_v4, 0.0 }
 0x360   :  { %v1029_v7 = vpack.c.bf16 %v428_v6, %v427_v5 }
 0x362   :  { %1030 = vmatprep.subr.bf16.mxu1 %v1029_v7 }
 0x363   :  { %1032 = vmatpush3.bf16.msra.mxu1 %v1029_v7 }
 0x364   :  { %1034 = vmatprep.subr.bf16.mxu1 %v1033_v10 }
 0x366   :  { %962 = vmatmul.mubr.msk.f32.vlgmr.msra.gmra.mrb[4].mxu1 %vm144_vm0, %v854_v39 }
 0x367   :  { %1036 = vmatpush3.bf16.msra.mxu1 %v1033_v10 }
 0x368   :  { %1038 = vmatprep.subr.bf16.mxu1 %v1037_v13 }
 0x439   :  { %v963_v14 = vpop.f32.mrb[4].mxu1 }
 0x43a   :  { %v495_v15 = vpop.f32.mrb[5].mxu1  ;;  %v505_v17 = vmul.f32 %v963_v14, %v234_v49 }
 0x43b   :  { %v504_v16 = vmul.f32 %v495_v15, %v229_v46 }
 0x43d   :  { %968 = vmatprep.mubr.msk.f32.mxu1 %vm144_vm0, %v504_v16 }
 0x43e   :  { %969 = vmatmul.mubr.msk.f32.vlgmr.msra.gmra.mrb[6].mxu1 %vm144_vm0, %v505_v17 }
 0x43f   :  { %1040 = vmatpush3.bf16.msra.mxu1 %v1037_v13  ;;  %975 = vmatprep.mubr.msk.f32.mxu1 %vm144_vm0, %v427_v5 }
 0x440   :  { %1042 = vmatprep.subr.bf16.mxu1 %v1041_v29 }
 0x446   :  { %976 = vmatmul.mubr.msk.f32.vlgmr.msra.gmra.mrb[6].mxu1 %vm144_vm0, %v428_v6 }
 0x447   :  { %1044 = vmatpush3.bf16.msra.mxu1 %v1041_v29 }
 0x519   :  { %v977_v19 = vpop.f32.mrb[6].mxu1 }
 0x51a   :  { %v1047_v20 = vadd.f32 %v977_v19, %v841_v18  ;;  %v673_v21 = vpop.f32.mrb[7].mxu1 }
 0x51b   :  { %v1048_v22 = vadd.f32 %v841_v18, %v673_v21 }
 0x51c   :  { %v685_v23 = vmul.f32 %v1047_v20, %v1047_v20 }
 0x51d   :  { %v684_v24 = vmul.f32 %v1048_v22, %v1048_v22 }
 0x51e   :  { %v689_v25 = vsel %vm144_vm0, %v685_v23, 0.0 }
 0x51f   :  { %690 = vadd.xlane.f32.xlu1 %v689_v25  ;;  %v686_v26 = vsel %vm144_vm0, %v684_v24, 0.0 }
 0x520   :  { %687 = vadd.xlane.f32.xlu0 %v686_v26 }
 0x5ac   :  { %v691_v30 = vpop.xlane.xlu1 %690 }
 0x5ad   :  { %v693_v31 = vmax.f32 %v691_v30, 1e-24  ;;  %v688_v32 = vpop.xlane.xlu0 %687 }
 0x5ae   :  { %v692_v33 = vmax.f32 %v688_v32, 1e-24 }
 0x5af   :  { %1062 = vrsqrt.f32 %v693_v31 }
 0x5b0   :  { %1064 = vrsqrt.f32 %v692_v33 }
 0x5b9   :  { %v1063_v34 = vpop.eup %1062 }
 0x5ba   :  { %v1065_v35 = vpop.eup %1064  ;;  %v697_v36 = vmul.f32 %v1063_v34, %v1047_v20 }
 0x5bb   :  { %v696_v37 = vmul.f32 %v1065_v35, %v1048_v22 }
 0x5bc   :  { %v699_v39 = vmax.f32 %v697_v36, 0.0 }
 0x5bd   :  { %v698_v38 = vmax.f32 %v696_v37, 0.0 }
 0x5bf   :  { %982 = vmatprep.mubr.msk.f32.mxu1 %vm144_vm0, %v698_v38 }
 0x5c0   :  { %983 = vmatmul.mubr.msk.f32.vlgmr.msra.gmra.mrb[8].mxu1 %vm144_vm0, %v699_v39 }
 0x693   :  { %v984_v41 = vpop.f32.mrb[8].mxu1 }
 0x694   :  { %v781_v42 = vpop.f32.mrb[9].mxu1  ;;  %v787_v44 = vadd.f32 %v984_v41, %v848_v40 }
 0x695   :  { %v782_v43 = vadd.f32 %v848_v40, %v781_v42 }
 0x697   :  { %790 = vmax.xlane.f32.xlu1 %v782_v43 }
 0x69b   :  { %792 = vmax.xlane.f32.xlu1 %v787_v44 }
 0x724   :  { %v791_v45 = vpop.xlane.xlu1 %790 }
 0x725   :  { %v794_v46 = vsub.f32 %v782_v43, %v791_v45 }
 0x727   :  { %v796_v47 = vmul.f32 1.442695, %v794_v46 }
 0x728   :  { %v793_v48 = vpop.xlane.xlu1 %792 }
 0x729   :  { %1066 = vpow2.f32 %v796_v47  ;;  %v795_v49 = vsub.f32 %v787_v44, %v793_v48 }
 0x72b   :  { %v798_v50 = vmul.f32 1.442695, %v795_v49 }
 0x72d   :  { %1068 = vpow2.f32 %v798_v50 }
 0x733   :  { %v1067_v51 = vpop.eup %1066 }
 0x734   :  { %800 = vadd.xlane.f32.xlu1 %v1067_v51 }
 0x737   :  { %v1069_v52 = vpop.eup %1068 }
 0x738   :  { %802 = vadd.xlane.f32.xlu1 %v1069_v52 }
 0x7c1   :  { %v801_v53 = vpop.xlane.xlu1 %800 }
 0x7c2   :  { %1070 = vlog2.f32 %v801_v53 }
 0x7c5   :  { %v803_v54 = vpop.xlane.xlu1 %802 }
 0x7c6   :  { %1072 = vlog2.f32 %v803_v54 }
 0x7cc   :  { %v1071_v55 = vpop.eup %1070 }
 0x7cd   :  { %v805_v56 = vmul.f32 0.6931472, %v1071_v55 }
 0x7cf   :  { %v808_v57 = vsub.f32 %v794_v46, %v805_v56 }
 0x7d0   :  { %v1073_v58 = vpop.eup %1072 }
 0x7d1   :  { %810 = vst [vmem:[#allocation2] sm:$0xff] %v808_v57  ;;  %v807_v59 = vmul.f32 0.6931472, %v1073_v58 }
 0x7d3   :  { %v809_v60 = vsub.f32 %v795_v49, %v807_v59 }
 0x7d5   :  { %811 = vst [vmem:[#allocation2 + $0x8] sm:$0xff] %v809_v60 }
 0x7d6   :  { %1085 = shalt.err (!%p1082_p4)
}
 0x7d7   :  { %s1086_s2 = scalar_lea.hbm %s1306_s10, 256 }
 0x7d8   :  { %p1087_p5 = scmp.ne.s32.totalorder %s1306_s10, %s1086_s2  ;;  %p1090_p6 = scmp.lt.u32.totalorder %s1086_s2, %s1306_s10 }
 0x7da   :  { %p1092_p7 = pnand %p1090_p6, %p1087_p5 }
 0x7dc   :  { %1095 = shalt.err (!%p1092_p7)
}
 0x7dd   :  { %s1100_s18 = smov 128   ;;  %s1101_s19 = smov 8  }
 0x7de   :  { %823 = dma.vmem_to_hbm [thread:$0]  %s818_s0, 256, %s1306_s10, [#allocation3], %s1100_s18, %s1100_s18, %s1101_s19  }
 0x7df   :  { %1096 = dma.done.wait [#allocation3], 256  }
 0x7e0   :  { %1097 = vsyncadd [#allocation3], 4294967040 }
 0x7e1   :  { %827 = vsyncpa [#allocation3], 1 }

</bundles_post_ra>
